<compile_context>
chip_gen: v7x
topology: tpu7x:2x2x1
jax: 0.10.0
libtpu: 0.0.40
codegen_flags: <defaults>
</compile_context>

<pallas_src>
import math

import jax
import jax.numpy as jnp
from jax.experimental import pallas as pl
from jax.experimental.pallas import tpu as pltpu


def _modconv1x1_kernel(w_ref, x_ref, out_ref):
    # w_ref:  (C_out, C_in)  per-batch demodulated weight, compute_dtype
    # x_ref:  (C_in, TILE)   activation tile, compute_dtype
    # out_ref:(C_out, TILE)
    out_ref[...] = jnp.dot(
        w_ref[...], x_ref[...], preferred_element_type=jnp.float32
    ).astype(out_ref.dtype)


def _pick_tile(HW, C_in, C_out, bytes_x, bytes_out, max_tile_hw, vmem_tile_budget):
    """Largest lane-dense spatial tile (multiple of 128) fitting the VMEM budget.

    Budget model: double-buffered x tile + double-buffered out tile +
    double-buffered per-batch weight.
    """
    hw128 = pl.cdiv(HW, 128) * 128
    w_bytes = 2 * C_out * C_in * bytes_x

    def need(t):
        return 2 * t * (C_in * bytes_x + C_out * bytes_out) + w_bytes

    # If the whole (128-padded) spatial extent fits, take it in one tile.
    if hw128 <= max_tile_hw and need(hw128) <= vmem_tile_budget:
        return hw128
    tile = 256
    while True:
        nxt = tile + 256
        if nxt > max_tile_hw or nxt > hw128 or need(nxt) > vmem_tile_budget:
            break
        tile = nxt
    return min(tile, hw128)


def modulated_conv2d(x, style, weight, mod_w, mod_b, *, eps=1e-8, upsample=False,
                     compute_dtype=jnp.bfloat16, out_dtype=None,
                     max_tile_hw=2048, vmem_tile_budget=32 * 1024 * 1024,
                     vmem_limit_bytes=48 * 1024 * 1024):
    """ModulatedConv2d forward for the module-default path (kernel_size=1, no upsample).

    x:      (B, C_in, H, W)
    style:  (B, style_dim)
    weight: (1, C_out, C_in, 1, 1)      -- self.weight
    mod_w:  (style_dim, C_in)           -- modulation.weight, transposed
    mod_b:  (1, C_in)                   -- modulation.bias
    """
    if upsample:
        # TODO(synk): upsample=True path (conv_transpose2d stride-2 + Blur2 /
        # upfirdn2d) has no clean Pallas equivalent here and is not implemented.
        raise NotImplementedError("upsample=True path not implemented")
    _, out_channel, in_channel, kh, kw = weight.shape
    if kh != 1 or kw != 1:
        # TODO(synk): kernel_size > 1 spatial conv not implemented in Pallas;
        # only the module-default 1x1 path is covered.
        raise NotImplementedError("only kernel_size=1 is supported")

    B, C_in, H, W = x.shape
    assert C_in == in_channel
    C_out = out_channel
    out_dtype = compute_dtype if out_dtype is None else out_dtype
    scale = 1.0 / math.sqrt(in_channel * kh * kw)

    # ---- tiny per-batch weight build (f32, XLA prologue; O(B*C_out*C_in)) ----
    # Modulation Linear + scale folded into the (B, C_in) row, then demod.
    mod = (style.astype(jnp.float32) @ mod_w.astype(jnp.float32)
           + mod_b.astype(jnp.float32)) * scale                        # (B, C_in)
    w_base = weight.reshape(C_out, C_in).astype(jnp.float32)
    w_mod = w_base[None, :, :] * mod[:, None, :]                       # (B, C_out, C_in)
    demod = jax.lax.rsqrt(jnp.sum(w_mod * w_mod, axis=-1, keepdims=True) + eps)
    w_mod = (w_mod * demod).astype(compute_dtype)                      # (B, C_out, C_in)

    # ---- lane-dense spatial axis + VMEM-budget-driven tile ----
    HW = H * W
    bytes_x = jnp.dtype(compute_dtype).itemsize
    bytes_out = jnp.dtype(out_dtype).itemsize
    tile = _pick_tile(HW, C_in, C_out, bytes_x, bytes_out,
                      max_tile_hw, vmem_tile_budget)
    HW_pad = pl.cdiv(HW, tile) * tile

    # Cast fused with pad (single pass over x); no pad at all when HW % tile == 0.
    x2 = x.reshape(B, C_in, HW).astype(compute_dtype)
    if HW_pad != HW:
        x2 = jnp.pad(x2, ((0, 0), (0, 0), (0, HW_pad - HW)))

    grid = (B, HW_pad // tile)

    out = pl.pallas_call(
        _modconv1x1_kernel,
        out_shape=jax.ShapeDtypeStruct((B, C_out, HW_pad), out_dtype),
        grid_spec=pltpu.PrefetchScalarGridSpec(
            num_scalar_prefetch=0,
            grid=grid,
            in_specs=[
                # per-batch demodulated weight: index depends only on b, so it
                # stays resident in VMEM across all spatial tiles of a batch.
                pl.BlockSpec((None, C_out, C_in), lambda b, t: (b, 0, 0)),
                # per-(batch, spatial-tile) activation tile (pipelined).
                pl.BlockSpec((None, C_in, tile), lambda b, t: (b, 0, t)),
            ],
            out_specs=pl.BlockSpec((None, C_out, tile), lambda b, t: (b, 0, t)),
        ),
        compiler_params=pltpu.CompilerParams(
            dimension_semantics=("parallel", "parallel"),
            vmem_limit_bytes=vmem_limit_bytes),
    )(w_mod, x2)

    if HW_pad != HW:
        out = out[:, :, :HW]
    return out.reshape(B, C_out, H, W)


def ref_forward(x, style, weight, mod_w, mod_b, eps=1e-8):
    """Pure-JAX f32 reference mirroring the PyTorch forward (no matmul ops,
    so it is immune to TPU default matmul-precision downcasting)."""
    B, C_in, H, W = x.shape
    _, C_out, _, kh, kw = weight.shape
    scale = 1.0 / math.sqrt(C_in * kh * kw)
    s = jnp.sum(style[:, :, None] * mod_w[None, :, :], axis=1) + mod_b[0]   # (B, C_in)
    w = scale * weight * s[:, None, :, None, None]                          # (B,C_out,C_in,1,1)
    demod = jax.lax.rsqrt(jnp.sum(w * w, axis=(2, 3, 4)) + eps)             # (B, C_out)
    w = w * demod[:, :, None, None, None]
    w2 = w[:, :, :, 0, 0]                                                   # (B, C_out, C_in)
    out = jnp.sum(w2[:, :, :, None, None] * x[:, None, :, :, :], axis=2)    # (B, C_out, H, W)
    return out


if __name__ == "__main__":
    # Small shapes consistent with the module (1x1 modulated conv).
    B, C_in, C_out = 2, 8, 16
    H = W = 16
    style_dim = 32

    key = jax.random.PRNGKey(0)
    kx, ks, kw, kmw, kmb, kx2 = jax.random.split(key, 6)

    x = jax.random.normal(kx, (B, C_in, H, W), dtype=jnp.float32)
    style = jax.random.normal(ks, (B, style_dim), dtype=jnp.float32)
    weight = jax.random.normal(kw, (1, C_out, C_in, 1, 1), dtype=jnp.float32)
    bound = 1.0 / math.sqrt(style_dim)   # PyTorch nn.Linear default init bound
    mod_w = jax.random.uniform(kmw, (style_dim, C_in), minval=-bound,
                               maxval=bound, dtype=jnp.float32)
    mod_b = jax.random.uniform(kmb, (1, C_in), minval=-bound,
                               maxval=bound, dtype=jnp.float32)

    # Default path: bf16 activations/weights/output (MXU-native).
    out_bf16 = modulated_conv2d(x, style, weight, mod_w, mod_b)
    # Full-f32 path.
    out_f32 = modulated_conv2d(x, style, weight, mod_w, mod_b,
                               compute_dtype=jnp.float32, out_dtype=jnp.float32)
    jax.block_until_ready((out_bf16, out_f32))

    assert out_bf16.shape == (B, C_out, H, W)
    assert out_f32.shape == (B, C_out, H, W)

    ref = ref_forward(x, style, weight, mod_w, mod_b)
    # bf16 operands + bf16 output: ~1e-2-level relative error vs f32 reference.
    assert jnp.allclose(out_bf16.astype(jnp.float32), ref, atol=5e-2, rtol=5e-2)
    # f32 path: tighter (tolerance still conservative for TPU matmul precision).
    assert jnp.allclose(out_f32, ref, atol=1e-2, rtol=1e-2)

    # Exercise the padded-spatial path (HW % 128 != 0).
    H2 = W2 = 9
    x9 = jax.random.normal(kx2, (B, C_in, H2, W2), dtype=jnp.float32)
    out9 = modulated_conv2d(x9, style, weight, mod_w, mod_b)
    jax.block_until_ready(out9)
    ref9 = ref_forward(x9, style, weight, mod_w, mod_b)
    assert out9.shape == (B, C_out, H2, W2)
    assert jnp.allclose(out9.astype(jnp.float32), ref9, atol=5e-2, rtol=5e-2)

    print("KERNEL_OK")
</pallas_src>

<mosaic_0001>
module attributes {stable_mosaic.version = 11 : i64} {
  func.func @_modconv1x1_kernel(%arg0: i32, %arg1: i32, %arg2: memref<1x16x8xbf16, #tpu.memory_space<vmem>>, %arg3: memref<1x8x256xbf16, #tpu.memory_space<vmem>>, %arg4: memref<1x16x256xbf16, #tpu.memory_space<vmem>>) attributes {dimension_semantics = [#tpu.dimension_semantics<parallel>, #tpu.dimension_semantics<parallel>], iteration_bounds = array<i64: 2, 1>, scalar_prefetch = 0 : i64, scratch_operands = 0 : i64, tpu.core_type = #tpu.core_type<tc>, window_params = [{transform_indices = @transform_0, window_bounds = array<i64: 1, 16, 8>}, {transform_indices = @transform_1, window_bounds = array<i64: 1, 8, 256>}, {transform_indices = @transform_2, window_bounds = array<i64: 1, 16, 256>}]} {
    %c0 = arith.constant 0 : index
    %c0_0 = arith.constant 0 : index
    %c0_1 = arith.constant 0 : index
    %0 = vector.load %arg2[%c0, %c0_0, %c0_1] : memref<1x16x8xbf16, #tpu.memory_space<vmem>>, vector<1x16x8xbf16>
    %1 = vector.shape_cast %0 : vector<1x16x8xbf16> to vector<16x8xbf16>
    %c0_2 = arith.constant 0 : index
    %c0_3 = arith.constant 0 : index
    %c0_4 = arith.constant 0 : index
    %2 = vector.load %arg3[%c0_2, %c0_3, %c0_4] : memref<1x8x256xbf16, #tpu.memory_space<vmem>>, vector<1x8x256xbf16>
    %3 = vector.shape_cast %2 : vector<1x8x256xbf16> to vector<8x256xbf16>
    %cst = arith.constant dense<0.000000e+00> : vector<16x256xf32>
    %4 = tpu.matmul %1, %3, %cst {dimension_numbers = #tpu.dot_dimension_numbers<[1], [0], [0], [1], [0, 0, 1, 1], [], []>} : vector<16x8xbf16>, vector<8x256xbf16>, vector<16x256xf32> -> vector<16x256xf32>
    %5 = arith.truncf %4 : vector<16x256xf32> to vector<16x256xbf16>
    %c0_5 = arith.constant 0 : index
    %c0_6 = arith.constant 0 : index
    %c0_7 = arith.constant 0 : index
    %6 = vector.load %arg4[%c0_5, %c0_6, %c0_7] : memref<1x16x256xbf16, #tpu.memory_space<vmem>>, vector<1x16x256xbf16>
    %7 = vector.shape_cast %6 : vector<1x16x256xbf16> to vector<16x256xbf16>
    %8 = vector.shape_cast %5 : vector<16x256xbf16> to vector<1x16x256xbf16>
    tpu.vector_store %arg4[%c0_5, %c0_6, %c0_7], %8 {strides = array<i32>} : memref<1x16x256xbf16, #tpu.memory_space<vmem>>, vector<1x16x256xbf16>,
    return
  }
  func.func @transform_0(%arg0: i32, %arg1: i32) -> (i32, i32, i32) {
    %c0_i32 = arith.constant 0 : i32
    %c0_i32_0 = arith.constant 0 : i32
    %c0_i32_1 = arith.constant 0 : i32
    return %arg0, %c0_i32, %c0_i32_0 : i32, i32, i32
  }
  func.func @transform_1(%arg0: i32, %arg1: i32) -> (i32, i32, i32) {
    %c0_i32 = arith.constant 0 : i32
    %c0_i32_0 = arith.constant 0 : i32
    return %arg0, %c0_i32, %arg1 : i32, i32, i32
  }
  func.func @transform_2(%arg0: i32, %arg1: i32) -> (i32, i32, i32) {
    %c0_i32 = arith.constant 0 : i32
    %c0_i32_0 = arith.constant 0 : i32
    return %arg0, %c0_i32, %arg1 : i32, i32, i32
  }
}

</mosaic_0001>

<bundles_post_ra>
// kernel: tpu_custom_call.1
= control target key start
LH: loop header
LB: loop body
LE: loop exit
PB: predicated region body
PF: predicated region fallthrough
CT: control target
= control target key end

     0   :  { %7 = vsyncpa [#allocation3], 0  ;;  %s687_s0 = inlined_call_operand.vmem [shape: bf16[2,16,8], index: 0, kind: input, shape index: {}]   ;;  %s688_s1 = inlined_call_operand.vmem [shape: bf16[2,8,256], index: 1, kind: input, shape index: {}]   ;;  %s689_s2 = inlined_call_operand.hbm [shape: bf16[2,16,256], index: 2, kind: output, shape index: {}]  }
   0x1   :  { %9 = vsyncpa [#allocation3 + $0x1], 0  ;;  %s569_s9 = smov 0   ;;  %s571_s10 = smov 0  }
   0x2   :  { %s573_s11 = smov 0   ;;  %s575_s12 = smov 0  }
   0x3   :  { %s577_s13 = smov 0   ;;  %s579_s14 = smov 0  }
   0x4 LB: > { %s382_s15 = sadd.s32 4294967295, %s548_s14   ;;  %s383_s16 = sadd.s32 4294967294, %s548_s14   ;;  %s548_s14 = sphi %s579_s14, %s15_s14   ;;  %s544_s13 = sphi %s577_s13, %s696_s13   ;;  %s540_s12 = sphi %s575_s12, %s695_s12   ;;  %s536_s11 = sphi %s573_s11, %s694_s11   ;;  %s532_s10 = sphi %s571_s10, %s693_s10   ;;  %s528_s9 = sphi %s569_s9, %s692_s9  }
   0x5   : > { %s27_s17 = sadd.s32 1, %s544_s13  ;;  %s90_s18 = sadd.s32 1, %s536_s11 }
   0x6   : > { %p29_p0 = scmp.ge.s32.totalorder %s27_s17, 2  ;;  %p100_p1 = scmp.ne.s32.totalorder %s536_s11, %s532_s10 }
   0x7   : > { %p101_p2 = scmp.eq.s32.totalorder %s382_s15, 1  ;;  %p106_p3 = scmp.ne.s32.totalorder %s532_s10, %s528_s9 }
   0x8   : > { %s698_s17 = smov (%p29_p0, %s27_s17), 0  ;;  %p107_p5 = scmp.eq.s32.totalorder %s383_s16, 1 }
   0x9   : > { %p609_p4 = por %p101_p2, %p100_p1  ;;  %s85_s20 = ssub.s32 %s544_s13, %s698_s17 }
   0xa   : > { %p386_p6 = scmp.ge.s32.totalorder %s548_s14, 1  ;;  %p88_p7 = scmp.eq.s32.totalorder %s85_s20, 0 }
   0xb   : > { %p616_p8 = por %p107_p5, %p106_p3  ;;  %p146_p9 = scmp.lt.s32.totalorder %s548_s14, 3 }
   0xc   : > { %s622_s22 = scalar_select %p88_p7, %s536_s11, %s90_s18  }
   0xd   : > { %p147_p10 = pnand %p386_p6, %p146_p9 }
   0xe   : > { %p177_p11 = scmp.lt.s32.totalorder (!%p147_p10), %s540_s12, 1  ;;  %v550_v0 = vmov (!%p147_p10), 0   ;;  %vm211_vm0 = vcmask (!%p147_p10), 1043456   ;;  %vm207_vm1 = vcmask (!%p147_p10), 64512   ;;  %s174_s3 = sand.u32 (!%p147_p10), 1, %s532_s10  }
   0xf   : > { %150 = sbr.rel (%p147_p10) target bundleno = 265 (0x109), region = 28  ;;  %250 = vmatprep.mubr.bf16.mxu0 (!%p147_p10), %v550_v0  ;;  %s387_s4 = sshll.u32 (!%p147_p10), %s174_s3, 4 }
  0x10   : > { %s176_s5 = scalar_lea.vmem (!%p147_p10), [#allocation2], %s387_s4  ;;  %s408_s7 = sshll.u32 (!%p147_p10), %s540_s12, 8 }
  0x11   : > { %s291_s6 = sshll.u32 (!%p147_p10), %s176_s5, 4  ;;  %s639_s16 = scalar_lea.hbm (!%p147_p10), %s689_s2, %s408_s7  ;;  %s634_s6 = int_to_ptr.vmem [resolvable:$true] %s291_s6 }
  0x12   : > { %s641_s18 = scalar_lea.sflag (!%p147_p10), [#allocation3], %s174_s3  ;;  %s551_s20 = smov (!%p147_p10), [#allocation2]  }
  0x16   : > { %s178_s23 = scalar_select %p177_p11, %s540_s12, 1 }
  0x17   : > { %s470_s12 = scalar_lea.vmem %s634_s6, 256 }
  0x18   : > { %s404_s24 = sshll.u32 %s178_s23, 3  ;;  %p471_p12 = scmp.ne.s32.totalorder %s634_s6, %s470_s12 }
  0x19   : > { %s181_s27 = scalar_lea.vmem %s687_s0, %s404_s24  ;;  %s190_s30 = scalar_lea.vmem %s688_s1, %s404_s24 }
  0x1a   : > { %v196_v1 = vld [vmem:[%s190_s30] sm:$0xff]  ;;  %p472_p13 = pnand %p471_p12, %p609_p4  ;;  %s474_s23 = sshll.u32 %s551_s20, 4  ;;  %s475_s23 = int_to_ptr.vmem [resolvable:$false] %s474_s23 }
  0x1b   : > { %v394_v2 = vcombine.high %v196_v1, %v196_v1  ;;  %v393_v3 = vcombine.low %v196_v1, %v196_v1  ;;  %v467_v4 = vld [vmem:[%s181_s27] sm:$0xff]   ;;  %s476_s24 = scalar_lea.vmem %s475_s23, 512  ;;  %p477_p1 = scmp.lt.s32.totalorder %s634_s6, %s475_s23 }
  0x1c   : > { %p473_p0 = pneg %p472_p13  ;;  %p478_p2 = scmp.lt.s32.totalorder %s476_s24, %s470_s12 }
  0x1d   : > { %395 = vmatprep.subr.msk.bf16.mxu0 %vm211_vm0, %v394_v2  ;;  %v213_v5 = vsel %vm211_vm0, %v393_v3, 0 }
  0x1e   : > { %219 = vmatpush1.bf16.msra.mxu0 %v213_v5  ;;  %p479_p3 = por %p478_p2, %p477_p1 }
  0x20   : > { %p480_p5 = pnand %p479_p3, %p473_p0 }
  0x21   : > { %396 = vmatmul.mubr.msk.bf16.vlgmr.msra.gmra.mrb[0].mxu0 %vm207_vm1, %v467_v4 }
  0xf4   : > { %v252_v6 = vpop.f32.mrb[0].mxu0 }
  0xf5   : > { %v254_v7 = vpop.f32.mrb[1].mxu0 }
  0xf6   : > { %v406_v8 = vpack.c.bf16 %v254_v7, %v252_v6  ;;  %v256_v9 = vpop.f32.mrb[2].mxu0 }
  0xf7   : > { %v258_v10 = vpop.f32.mrb[3].mxu0 }
  0xf8   : > { %273 = vst [vmem:[%s176_s5] sm:$0xff] %v406_v8  ;;  %v407_v11 = vpack.c.bf16 %v258_v10, %v256_v9 }
  0xfa   : > { %274 = vst [vmem:[%s176_s5 + $0x8] sm:$0xff] %v407_v11 }
  0xfb   : > { %483 = shalt.err (!%p480_p5)
}
  0xfc   : > { %s484_s25 = scalar_lea.hbm %s639_s16, 256  ;;  %s488_s28 = scalar_lea.hbm %s689_s2, 512 }
  0xfd   : > { %p485_p6 = scmp.ne.s32.totalorder %s639_s16, %s484_s25  ;;  %p489_p10 = scmp.lt.u32.totalorder %s639_s16, %s689_s2 }
  0xfe   : > { %p490_p11 = scmp.lt.u32.totalorder %s488_s28, %s484_s25  ;;  %p492_p13 = scmp.lt.u32.totalorder %s484_s25, %s639_s16 }
  0xff   : > { %p486_p7 = pnand %p485_p6, %p609_p4 }
 0x100   : > { %p491_p12 = por %p490_p11, %p489_p10 }
 0x101   : > { %p487_p9 = pneg %p486_p7 }
 0x102   : > { %p493_p0 = por %p492_p13, %p491_p12 }
 0x104   : > { %p494_p1 = pnand %p493_p0, %p487_p9 }
 0x106   : > { %497 = shalt.err (!%p494_p1)
}
 0x107   : > { %s552_s3 = smov 128   ;;  %s553_s4 = smov 8  }
 0x108   : > { %409 = dma.vmem_to_hbm [thread:$0]  (%p609_p4), %s634_s6, 256, %s639_s16, %s641_s18, %s552_s3, %s552_s3, %s553_s4  }
 0x109 PF: > { %p415_p2 = scmp.ge.s32.totalorder %s548_s14, 2  ;;  %s306_s5 = sand.u32 1, %s528_s9  }
 0x10a   : > { %s307_s7 = scalar_lea.sflag [#allocation3], %s306_s5 }
 0x10b   : > { %p412_p3 = pnand %p415_p2, %p616_p8 }
 0x10d   : > { %523 = dma.done.wait (!%p412_p3), %s307_s7, 256  }
 0x10e   : > { %525 = vsyncadd (!%p412_p3), %s307_s7, 4294967040  ;;  %s15_s14 = sadd.s32 1, %s548_s14   ;;  %s692_s9 = smov %s532_s10 }
 0x10f   : > { %p12_p5 = scmp.ge.s32.totalorder %s15_s14, 4   ;;  %s693_s10 = smov %s536_s11 }
 0x110   : > { %s694_s11 = smov %s622_s22  ;;  %s695_s12 = smov %s544_s13 }
 0x111   : > { %s696_s13 = smov %s698_s17  ;;  %14 = sbr.rel (!%p12_p5) target bundleno = 4 (0x4), region = 66 }
 0x118   :  { %312 = vsyncpa [#allocation3], 1 }
 0x119   :  { %314 = vsyncpa [#allocation3 + $0x1], 1 }

</bundles_post_ra>
